<compile_context>
chip_gen: v5e
topology: v5e:2x2
jax: 0.10.0
libtpu: 0.0.40
codegen_flags: <defaults>
</compile_context>

<pallas_src>
import math

import jax
import jax.numpy as jnp
from jax.experimental import pallas as pl
from jax.experimental.pallas import tpu as pltpu


def initfunc_kernel(x_ref, w_ref, o_ref):
    # x_ref: (TM, 1), w_ref: (1, TN), o_ref: (TM, TN)
    # Single fused VPU broadcast multiply; K=1 "matmul" never needs the MXU.
    # All of this hides under the output store / writeback DMA bottleneck.
    o_ref[...] = (x_ref[...] * w_ref[...]).astype(o_ref.dtype)


def initfunc(x, x0, *, tile_bytes=16 * 1024 * 1024, force_pallas=False,
             min_pallas_elems=2 * 1024 * 1024):
    """Forward of Initfunc.

    x  : (..., 1) input (PyTorch nn.Linear(1, outdim) input layout)
    x0 : (outdim, 1) weight (PyTorch nn.Linear weight layout)

    tile_bytes bounds the per-grid-step VMEM footprint of one (output tile +
    input tile) buffer set (double-buffered by the pipeline). The default
    16 MiB amortizes per-step overhead to <10% even on v7x HBM and stays well
    under every generation's VMEM with the 48 MiB scoped limit below.
    """
    assert x.shape[-1] == 1, "in_features must be 1"
    outdim = int(x0.shape[0])
    batch_shape = x.shape[:-1]
    N = int(math.prod(batch_shape)) if batch_shape else 1

    out_dtype = jnp.result_type(x.dtype, x0.dtype)
    x2 = x.reshape(N, 1)
    w_t = x0.reshape(1, outdim)  # contiguous view of the (outdim, 1) weight

    # Small/medium problems: pallas_call + per-step overhead dominates and XLA
    # fuses the broadcast-multiply into consumers for free. Threshold ~8 MiB
    # of f32 output.
    if not force_pallas and N * outdim < min_pallas_elems:
        out = (x2 * w_t).astype(out_dtype)
        return out.reshape(*batch_shape, outdim)

    ob = jnp.dtype(out_dtype).itemsize
    xb = jnp.dtype(x2.dtype).itemsize
    wb = jnp.dtype(w_t.dtype).itemsize
    # Sub-32-bit dtypes pack along sublanes: native row group is 8 (f32),
    # 16 (bf16), 32 (int8/fp8).
    sublane_pack = 8 * max(1, 4 // ob)
    tile_bytes = max(int(tile_bytes), 64 * 1024)

    # Lane-dense output: pad outdim to a multiple of 128 when the extra HBM
    # writes are cheap (<= 12.5%), so every output store is an unmasked vst
    # and full-width tiles are contiguous slabs.
    outdim_p = outdim
    pad = 0
    if outdim % 128 != 0:
        cand = ((outdim + 127) // 128) * 128
        if (cand - outdim) * 8 <= outdim:
            outdim_p, pad = cand, cand - outdim
    w_p = jnp.pad(w_t, ((0, 0), (0, pad))) if pad else w_t

    # --- Tile selection: full-width tn first, then give tm the rest. ---
    # VMEM cost of one buffer set per grid step:
    #   output tile: tm * tn * ob
    #   x tile (tm, 1): lane-padded to 128 lanes -> tm * 128 * xb
    #   w tile (1, tn): tiny, resident (8 * tn * wb)
    row_bytes_full = outdim_p * ob + 128 * xb
    if sublane_pack * row_bytes_full <= tile_bytes:
        tn = outdim_p                       # full width: contiguous writeback
    else:
        # Extremely wide outdim: fall back to a lane-aligned partial width.
        tn = ((tile_bytes // (sublane_pack * ob)) // 128) * 128
        tn = min(outdim_p, max(128, tn))
    row_bytes = tn * ob + 128 * xb
    tm_cap = max(sublane_pack, (tile_bytes // row_bytes) // sublane_pack * sublane_pack)
    tm = N if N <= tm_cap else tm_cap       # full dim N is always a legal block

    grid = (pl.cdiv(N, tm), pl.cdiv(outdim_p, tn))

    cost = pl.CostEstimate(
        flops=N * outdim_p,
        transcendentals=0,
        bytes_accessed=N * xb + outdim_p * wb + N * outdim_p * ob,
    )

    out = pl.pallas_call(
        initfunc_kernel,
        out_shape=jax.ShapeDtypeStruct((N, outdim_p), out_dtype),
        grid=grid,
        in_specs=[
            pl.BlockSpec((tm, 1), lambda i, j: (i, 0)),
            pl.BlockSpec((1, tn), lambda i, j: (0, j)),
        ],
        out_specs=pl.BlockSpec((tm, tn), lambda i, j: (i, j)),
        compiler_params=pltpu.CompilerParams(
            # Independent output tiles -> shard across TensorCores on v7x
            # (2 TCs); neutral on v5e/v6e. If xprof shows a single TC active
            # on v7x, switch the larger axis to pltpu.CORE_PARALLEL.
            dimension_semantics=("parallel", "parallel"),
            # Covers double-buffered 16 MiB tile sets; safe under v7x's 64 MiB
            # physical VMEM and v5e/v6e's 128 MiB.
            vmem_limit_bytes=48 * 1024 * 1024,
        ),
        cost_estimate=cost,
    )(x2, w_p)

    if pad:
        out = out[:, :outdim]
    return out.reshape(*batch_shape, outdim)


if __name__ == "__main__":
    key = jax.random.PRNGKey(0)
    k_w, k_x, k_xs, k_wp = jax.random.split(key, 4)

    # Small-but-representative shapes for nn.Linear(1, outdim).
    outdim = 384
    N = 256

    x0 = jax.random.normal(k_w, (outdim, 1), dtype=jnp.float32)  # weight source
    x = jax.random.normal(k_x, (N, 1), dtype=jnp.float32)        # inputs
    ref = x @ x0.T

    # Force the Pallas path with a tiny tile budget so the tiled multi-step
    # grid (full-width tn, 32-row tm -> 8x1 grid) is actually exercised.
    out = jax.block_until_ready(initfunc(x, x0, tile_bytes=64 * 1024,
                                         force_pallas=True))
    assert out.shape == (N, outdim)
    assert jnp.allclose(out, ref, atol=1e-6, rtol=1e-6)

    # Default-config Pallas path (single full-extent tile).
    out2 = jax.block_until_ready(initfunc(x, x0, force_pallas=True))
    assert jnp.allclose(out2, ref, atol=1e-6, rtol=1e-6)

    # Ragged outdim (1000) -> lane-padded output (1024) path, sliced back.
    outdim2 = 1000
    x0p = jax.random.normal(k_wp, (outdim2, 1), dtype=jnp.float32)
    out3 = jax.block_until_ready(initfunc(x, x0p, tile_bytes=256 * 1024,
                                          force_pallas=True))
    assert out3.shape == (N, outdim2)
    assert jnp.allclose(out3, x @ x0p.T, atol=1e-6, rtol=1e-6)

    # Tiny-size path: wrapper falls back to plain XLA (launch overhead
    # dominates at ~1 KiB of output).
    x_small = jax.random.normal(k_xs, (8, 1), dtype=jnp.float32)
    x0_small = x0[:32]
    out_small = jax.block_until_ready(initfunc(x_small, x0_small))
    assert out_small.shape == (8, 32)
    assert jnp.allclose(out_small, x_small @ x0_small.T, atol=1e-6, rtol=1e-6)

    print("KERNEL_OK")
</pallas_src>

<mosaic_0001>
module attributes {stable_mosaic.version = 11 : i64} {
  func.func @initfunc_kernel(%arg0: i32, %arg1: i32, %arg2: memref<32x1xf32, #tpu.memory_space<vmem>>, %arg3: memref<1x384xf32, #tpu.memory_space<vmem>>, %arg4: memref<32x384xf32, #tpu.memory_space<vmem>>) attributes {dimension_semantics = [#tpu.dimension_semantics<parallel>, #tpu.dimension_semantics<parallel>], iteration_bounds = array<i64: 8, 1>, scalar_prefetch = 0 : i64, scratch_operands = 0 : i64, tpu.core_type = #tpu.core_type<tc>, window_params = [{transform_indices = @transform_0, window_bounds = array<i64: 32, 1>}, {transform_indices = @transform_1, window_bounds = array<i64: 1, 384>}, {transform_indices = @transform_2, window_bounds = array<i64: 32, 384>}]} {
    %c0 = arith.constant 0 : index
    %c0_0 = arith.constant 0 : index
    %0 = vector.load %arg2[%c0, %c0_0] : memref<32x1xf32, #tpu.memory_space<vmem>>, vector<32x1xf32>
    %c0_1 = arith.constant 0 : index
    %c0_2 = arith.constant 0 : index
    %1 = vector.load %arg3[%c0_1, %c0_2] : memref<1x384xf32, #tpu.memory_space<vmem>>, vector<1x384xf32>
    %2 = vector.broadcast %0 : vector<32x1xf32> to vector<32x384xf32>
    %3 = vector.broadcast %1 : vector<1x384xf32> to vector<32x384xf32>
    %4 = arith.mulf %2, %3 : vector<32x384xf32>
    %c0_3 = arith.constant 0 : index
    %c0_4 = arith.constant 0 : index
    %5 = vector.load %arg4[%c0_3, %c0_4] : memref<32x384xf32, #tpu.memory_space<vmem>>, vector<32x384xf32>
    tpu.vector_store %arg4[%c0_3, %c0_4], %4 {strides = array<i32>} : memref<32x384xf32, #tpu.memory_space<vmem>>, vector<32x384xf32>,
    return
  }
  func.func @transform_0(%arg0: i32, %arg1: i32) -> (i32, i32) {
    %c0_i32 = arith.constant 0 : i32
    %c0_i32_0 = arith.constant 0 : i32
    return %arg0, %c0_i32 : i32, i32
  }
  func.func @transform_1(%arg0: i32, %arg1: i32) -> (i32, i32) {
    %c0_i32 = arith.constant 0 : i32
    %c0_i32_0 = arith.constant 0 : i32
    return %c0_i32, %arg1 : i32, i32
  }
  func.func @transform_2(%arg0: i32, %arg1: i32) -> (i32, i32) {
    %c0_i32 = arith.constant 0 : i32
    return %arg0, %arg1 : i32, i32
  }
}

</mosaic_0001>

<bundles_post_ra>
// kernel: tpu_custom_call.1
= control target key start
LH: loop header
LB: loop body
LE: loop exit
PB: predicated region body
PF: predicated region fallthrough
CT: control target
= control target key end

     0   :  { %7 = vsyncpa [#allocation3], 0  ;;  %s615_s0 = inlined_call_operand.vmem [shape: f32[256,1], index: 0, kind: input, shape index: {}]   ;;  %s616_s1 = inlined_call_operand.vmem [shape: f32[1,384], index: 1, kind: input, shape index: {}]   ;;  %s617_s2 = inlined_call_operand.hbm [shape: f32[256,384], index: 2, kind: output, shape index: {}]  }
   0x1   :  { %9 = vsyncpa [#allocation3 + $0x1], 0  ;;  %s512_s9 = smov 0   ;;  %s514_s10 = smov 0  }
   0x2   :  { %s516_s11 = smov 0   ;;  %s518_s12 = smov 0  }
   0x3   :  { %s520_s13 = smov 0   ;;  %s522_s14 = smov 0  }
   0x4 LB: > { %s339_s15 = sadd.s32 4294967295, %s492_s14   ;;  %s340_s16 = sadd.s32 4294967294, %s492_s14   ;;  %s492_s14 = sphi %s522_s14, %s15_s14   ;;  %s488_s13 = sphi %s520_s13, %s624_s13   ;;  %s484_s12 = sphi %s518_s12, %s623_s12   ;;  %s480_s11 = sphi %s516_s11, %s622_s11   ;;  %s476_s10 = sphi %s514_s10, %s621_s10   ;;  %s472_s9 = sphi %s512_s9, %s620_s9  }
   0x5   : > { %s27_s17 = sadd.s32 1, %s488_s13  ;;  %s88_s18 = sadd.s32 1, %s480_s11 }
   0x6   : > { %p29_p0 = scmp.ge.s32.totalorder %s27_s17, 8  ;;  %p98_p1 = scmp.ne.s32.totalorder %s480_s11, %s476_s10 }
   0x7   : > { %p99_p2 = scmp.eq.s32.totalorder %s339_s15, 7  ;;  %p104_p3 = scmp.ne.s32.totalorder %s476_s10, %s472_s9 }
   0x8   : > { %s626_s17 = smov (%p29_p0, %s27_s17), 0  ;;  %p105_p5 = scmp.eq.s32.totalorder %s340_s16, 7 }
   0x9   : > { %p552_p4 = por %p99_p2, %p98_p1  ;;  %s83_s20 = ssub.s32 %s488_s13, %s626_s17 }
   0xa   : > { %p344_p6 = scmp.ge.s32.totalorder %s492_s14, 1  ;;  %p86_p7 = scmp.eq.s32.totalorder %s83_s20, 0 }
   0xb   : > { %p559_p8 = por %p105_p5, %p104_p3  ;;  %p140_p9 = scmp.lt.s32.totalorder %s492_s14, 9 }
   0xc   : > { %s565_s22 = scalar_select %p86_p7, %s480_s11, %s88_s18  }
   0xd   : > { %p141_p10 = pnand %p344_p6, %p140_p9 }
   0xe   : > { %s345_s23 = sshll.u32 (!%p141_p10), %s484_s12, 2  ;;  %s163_s28 = sand.u32 (!%p141_p10), 1, %s476_s10  }
   0xf   : > { %144 = sbr.rel (%p141_p10) target bundleno = 158 (0x9e), region = 28  ;;  %p167_p11 = scmp.lt.s32.totalorder (!%p141_p10), %s345_s23, 31 }
  0x10   : > { %s352_s3 = smul.u32 (!%p141_p10), 96, %s163_s28  ;;  %s434_s25 = scalar_lea.hbm (!%p141_p10), %s617_s2, 768 }
  0x11   : > { %s353_s5 = smul.u32 (!%p141_p10), 96, %s484_s12  ;;  %s236_s12 = scalar_lea.sflag (!%p141_p10), [#allocation3], %s163_s28 }
  0x12   : > { %s165_s4 = scalar_lea.vmem (!%p141_p10), [#allocation2], %s352_s3 }
  0x13   : > { %s250_s8 = scalar_lea.hbm (!%p141_p10), %s617_s2, %s353_s5  ;;  %s251_s15 = sshll.u32 (!%p141_p10), %s165_s4, 4  ;;  %s252_s15 = int_to_ptr.vmem [resolvable:$true] %s251_s15 }
  0x14   : > { %v494_v0 = vmov 0   ;;  %s628_s23 = smov (!%p167_p11, %s345_s23), 31  ;;  %v183_v5 = vld [vmem:[%s616_s1] sm:$0x7]  ;;  %s253_s16 = sshll.u32 %s250_s8, 4  ;;  %s254_s16 = int_to_ptr.hbm [resolvable:$true] %s253_s16 }
  0x15   : > { %413 = vset.pattern.permute.xlu1 %v494_v0  ;;  %412 = vset.pattern.permute.xlu0 %v494_v0  ;;  %s346_s24 = sshll.u32 %s628_s23, 3  ;;  %v205_v6 = vperm.slane %v183_v5, 0  ;;  %v206_v7 = vperm.slane %v183_v5, 1  ;;  %v207_v8 = vperm.slane %v183_v5, 2  ;;  %s428_s18 = sshra.s32 %s254_s16, 4  ;;  %s429_s18 = int_to_ptr.hbm [resolvable:$true] %s428_s18 }
  0x16   : > { %s170_s27 = scalar_lea.vmem %s615_s0, %s346_s24  ;;  %s430_s20 = scalar_lea.hbm %s429_s18, 96 }
  0x17   : > { %v181_v1 = vld [vmem:[%s170_s27 + $0x10] sm:$0xff]  ;;  %v179_v2 = vld [vmem:[%s170_s27] sm:$0xff]  ;;  %v182_v3 = vld [vmem:[%s170_s27 + $0x18] sm:$0xff]  ;;  %p431_p12 = scmp.ne.s32.totalorder %s429_s18, %s430_s20  ;;  %p435_p1 = scmp.lt.s32.totalorder %s429_s18, %s617_s2 }
  0x18   : > { %196 = vperm.xlu1 %413, %v181_v1   ;;  %186 = vperm.xlu0 %412, %v179_v2   ;;  %v180_v4 = vld [vmem:[%s170_s27 + $0x8] sm:$0xff]  ;;  %p436_p2 = scmp.lt.s32.totalorder %s434_s25, %s430_s20 }
  0x19   : > { %p432_p13 = pnand %p431_p12, %p552_p4 }
  0x1a   : > { %p437_p3 = por %p436_p2, %p435_p1 }
  0x1b   : > { %p433_p0 = pneg %p432_p13 }
  0x1d   : > { %p438_p5 = pnand %p437_p3, %p433_p0 }
  0x20   : > { %201 = vperm.xlu1 %413, %v182_v3   ;;  %191 = vperm.xlu0 %412, %v180_v4  }
  0x8a   : > { %v197_v9 = vpop.permute.xlu1 %196  ;;  %v187_v10 = vpop.permute.xlu0 %186 }
  0x8b   : > { %v217_v11 = vmul.f32 %v205_v6, %v197_v9  ;;  %v218_v12 = vmul.f32 %v206_v7, %v197_v9  ;;  %v219_v13 = vmul.f32 %v207_v8, %v197_v9  ;;  %v211_v14 = vmul.f32 %v205_v6, %v187_v10 }
  0x8c   : > { %v212_v15 = vmul.f32 %v206_v7, %v187_v10  ;;  %v213_v16 = vmul.f32 %v207_v8, %v187_v10 }
  0x8d   : > { %229 = vst [vmem:[%s165_s4 + $0x30] sm:$0xff] %v217_v11 }
  0x8e   : > { %230 = vst [vmem:[%s165_s4 + $0x38] sm:$0xff] %v218_v12 }
  0x8f   : > { %231 = vst [vmem:[%s165_s4 + $0x40] sm:$0xff] %v219_v13 }
  0x90   : > { %223 = vst [vmem:[%s165_s4] sm:$0xff] %v211_v14 }
  0x91   : > { %224 = vst [vmem:[%s165_s4 + $0x8] sm:$0xff] %v212_v15 }
  0x92   : > { %225 = vst [vmem:[%s165_s4 + $0x10] sm:$0xff] %v213_v16  ;;  %v202_v17 = vpop.permute.xlu1 %201  ;;  %v192_v18 = vpop.permute.xlu0 %191 }
  0x93   : > { %v220_v19 = vmul.f32 %v205_v6, %v202_v17  ;;  %v221_v20 = vmul.f32 %v206_v7, %v202_v17  ;;  %v222_v21 = vmul.f32 %v207_v8, %v202_v17  ;;  %v214_v22 = vmul.f32 %v205_v6, %v192_v18 }
  0x94   : > { %v215_v23 = vmul.f32 %v206_v7, %v192_v18  ;;  %v216_v24 = vmul.f32 %v207_v8, %v192_v18 }
  0x95   : > { %232 = vst [vmem:[%s165_s4 + $0x48] sm:$0xff] %v220_v19 }
  0x96   : > { %233 = vst [vmem:[%s165_s4 + $0x50] sm:$0xff] %v221_v20 }
  0x97   : > { %234 = vst [vmem:[%s165_s4 + $0x58] sm:$0xff] %v222_v21 }
  0x98   : > { %226 = vst [vmem:[%s165_s4 + $0x18] sm:$0xff] %v214_v22 }
  0x99   : > { %227 = vst [vmem:[%s165_s4 + $0x20] sm:$0xff] %v215_v23 }
  0x9a   : > { %228 = vst [vmem:[%s165_s4 + $0x28] sm:$0xff] %v216_v24 }
  0x9b   : > { %441 = shalt.err (!%p438_p5)
}
  0x9c   : > { %s495_s28 = smov 384   ;;  %s496_s29 = smov 24  }
  0x9d   : > { %354 = dma.vmem_to_hbm [thread:$0]  (%p552_p4), %s252_s15, 1536, %s254_s16, %s236_s12, %s495_s28, %s495_s28, %s496_s29  }
  0x9e PF: > { %p360_p6 = scmp.ge.s32.totalorder %s492_s14, 2  ;;  %s268_s30 = sand.u32 1, %s472_s9  }
  0x9f   : > { %s269_s3 = scalar_lea.sflag [#allocation3], %s268_s30 }
  0xa0   : > { %p357_p7 = pnand %p360_p6, %p559_p8 }
  0xa2   : > { %p358_p9 = pneg %p357_p7 }
  0xa4   : > { %467 = dma.done.wait (%p358_p9), %s269_s3, 1536  }
  0xa5   : > { %469 = vsyncadd (%p358_p9), %s269_s3, 4294965760  ;;  %s15_s14 = sadd.s32 1, %s492_s14   ;;  %s620_s9 = smov %s476_s10 }
  0xa6   : > { %p12_p10 = scmp.ge.s32.totalorder %s15_s14, 10   ;;  %s621_s10 = smov %s480_s11 }
  0xa7   : > { %s622_s11 = smov %s565_s22  ;;  %s623_s12 = smov %s488_s13 }
  0xa8   : > { %s624_s13 = smov %s626_s17  ;;  %14 = sbr.rel (!%p12_p10) target bundleno = 4 (0x4), region = 66 }
  0xad   :  { %275 = vsyncpa [#allocation3], 1 }
  0xae   :  { %277 = vsyncpa [#allocation3 + $0x1], 1 }

</bundles_post_ra>
